<compile_context>
chip_gen: v7x
topology: tpu7x:2x2x1
jax: 0.10.0
libtpu: 0.0.40
codegen_flags: <defaults>
</compile_context>

<pallas_src>
import math
import functools

import jax
import jax.numpy as jnp
from jax import lax
from jax.experimental import pallas as pl
from jax.experimental.pallas import tpu as pltpu


def _round_up(n, m):
    return ((n + m - 1) // m) * m


# ---------------------------------------------------------------------------
# One-shot W pre-pass (outside the hot loop): row-L2-normalize W and store it
# TRANSPOSED, so the hot matmul is a canonical [M,K]x[K,N] contraction.
# ---------------------------------------------------------------------------
def _wnorm_t_kernel(w_ref, wt_ref, *, eps):
    w = w_ref[...].astype(jnp.float32)                        # (tile_r, K)
    # 1/clamp(||w||, eps) == rsqrt(max(sum w^2, eps^2))  -> EUP rsqrt
    inv = lax.rsqrt(jnp.maximum(jnp.sum(w * w, axis=-1, keepdims=True),
                                eps * eps))
    wt_ref[...] = (w * inv).T.astype(wt_ref.dtype)            # (K, tile_r)


def _normalize_and_transpose_w(weights_p, *, eps, op_dtype):
    n_pad, k = weights_p.shape                                # n_pad % 128 == 0
    tile_r = 128 if n_pad > 128 else n_pad                    # 128 | n_pad
    return pl.pallas_call(
        functools.partial(_wnorm_t_kernel, eps=eps),
        out_shape=jax.ShapeDtypeStruct((k, n_pad), op_dtype),
        grid=(n_pad // tile_r,),
        in_specs=[pl.BlockSpec((tile_r, k), lambda i: (i, 0))],
        out_specs=pl.BlockSpec((k, tile_r), lambda i: (0, i)),
        compiler_params=pltpu.CompilerParams(
            dimension_semantics=("parallel",)),
    )(weights_p)


# ---------------------------------------------------------------------------
# Hot kernel: normalize the x tile (once per row-block), MXU matmul against the
# pre-normalized, pre-transposed W tile, optional bias, store.
# ---------------------------------------------------------------------------
def _fixnorm_kernel(x_ref, wt_ref, *rest, g_scale, eps, has_bias, multi_n):
    idx = 0
    if has_bias:
        b_ref = rest[idx]; idx += 1
    o_ref = rest[idx]; idx += 1
    xn_ref = rest[idx] if multi_n else None

    def _norm_x():
        x = x_ref[...].astype(jnp.float32)                    # (tile_m, K)
        # 1/clamp(||x||, eps) == rsqrt(max(sum x^2, eps^2)) -> EUP rsqrt.
        inv = lax.rsqrt(jnp.maximum(jnp.sum(x * x, axis=-1, keepdims=True),
                                    eps * eps))
        # Fold g_scale into the small per-row LHS scale, not the output tile.
        return x * (g_scale * inv)

    if multi_n:
        # Recompute the normalized x tile only on the first N-tile of each row
        # block; reuse it from VMEM scratch for the remaining N-tiles.
        @pl.when(pl.program_id(1) == 0)
        def _():
            xn_ref[...] = _norm_x().astype(xn_ref.dtype)
        xn = xn_ref[...]
    else:
        xn = _norm_x().astype(wt_ref.dtype)

    out = lax.dot_general(
        xn, wt_ref[...],
        dimension_numbers=(((1,), (0,)), ((), ())),           # [M,K] x [K,N]
        preferred_element_type=jnp.float32)                   # (tile_m, tile_n)
    if has_bias:
        out = out + b_ref[...]
    o_ref[...] = out.astype(o_ref.dtype)


def fixnorm_linear(x, weights, bias=None, *, eps=1e-5, tile_m=256, tile_n=512,
                   mxu_bf16=False, force_tile_n=None):
    """x: (..., out_size); weights: (in_size, out_size); bias: (out_size,)|None."""
    in_size, out_size = weights.shape
    assert in_size == out_size, "module forward only shape-checks when in==out"
    K = out_size                 # contraction dim (x last dim == W column dim)
    N = in_size                  # output dim (W row dim)
    g_scale = math.sqrt(in_size)
    has_bias = bias is not None

    lead_shape = x.shape[:-1]
    x2 = x.reshape(-1, x.shape[-1])                           # (M, K)
    M, D = x2.shape
    assert D == K

    # MXU operand dtype: bf16 if both inputs are bf16, or opt-in via mxu_bf16.
    # Norm math and matmul accumulation stay f32 either way.
    op_dtype = (jnp.bfloat16
                if (mxu_bf16
                    or (x.dtype == jnp.bfloat16 and weights.dtype == jnp.bfloat16))
                else jnp.float32)
    w_item = jnp.dtype(op_dtype).itemsize
    x_item = x2.dtype.itemsize
    o_item = jnp.dtype(x.dtype).itemsize

    # --- pad the output/N axis to a lane-dense multiple of 128 --------------
    N_pad = _round_up(N, 128)
    weights_p = (weights if N_pad == N
                 else jnp.pad(weights, ((0, N_pad - N), (0, 0))))  # zero rows -> zero cols

    # One-shot, row-tiled W normalization, stored transposed: (K, N_pad).
    wt = _normalize_and_transpose_w(weights_p, eps=eps, op_dtype=op_dtype)

    if has_bias:
        bias2 = bias.astype(jnp.float32)
        if N_pad != N:
            bias2 = jnp.pad(bias2, (0, N_pad - N))
        bias2 = bias2.reshape(1, N_pad)

    # --- tile the flattened row axis ----------------------------------------
    tile_m = max(16, _round_up(min(int(tile_m), _round_up(M, 16)), 16))
    # v7x has 2 TensorCores: ensure the 'parallel' M axis has enough steps.
    while tile_m > 128 and pl.cdiv(M, tile_m) < 4:
        tile_m = _round_up(tile_m // 2, 16)
    M_pad = _round_up(M, tile_m)
    if M_pad != M:
        x2 = jnp.pad(x2, ((0, M_pad - M), (0, 0)))            # zero rows are harmless

    # --- N-axis tiling: keep W resident (single-buffered) only while it fits -
    resident_w_budget = 24 * 1024 * 1024                      # safe even on v7x (64 MiB)
    if force_tile_n is not None:
        tile_n_sel = min(_round_up(int(force_tile_n), 128), N_pad)
        while N_pad % tile_n_sel != 0:
            tile_n_sel -= 128
    elif K * N_pad * w_item <= resident_w_budget:
        tile_n_sel = N_pad
    else:
        tile_n_sel = min(_round_up(int(tile_n), 128), N_pad)
        while N_pad % tile_n_sel != 0:
            tile_n_sel -= 128
    tile_n = tile_n_sel
    multi_n = tile_n != N_pad

    scratch_shapes = ([pltpu.VMEM((tile_m, K), op_dtype)] if multi_n else [])
    operands = [x2, wt] + ([bias2] if has_bias else [])

    # --- VMEM budget (generation-aware) --------------------------------------
    w_bufs = 2 if multi_n else 1
    vmem_need = (2 * tile_m * K * x_item                      # x tile (double-buffered)
                 + w_bufs * K * tile_n * w_item               # W tile(s)
                 + 2 * tile_m * tile_n * o_item               # out tile (double-buffered)
                 + (w_bufs * 8 * tile_n * 4 if has_bias else 0)
                 + (tile_m * K * w_item if multi_n else 0)    # xn scratch
                 + 3 * tile_m * max(K, 128) * 4)              # in-kernel f32 temporaries
    try:
        vmem_cap = int(pltpu.get_tpu_info().vmem_capacity_bytes)
    except Exception:
        vmem_cap = 64 * 1024 * 1024                           # v7x per-core VMEM
    vmem_limit = int(min(max(int(1.5 * vmem_need), 32 * 1024 * 1024),
                         int(0.85 * vmem_cap)))

    cost = pl.CostEstimate(
        flops=2 * M_pad * K * N_pad,
        transcendentals=M_pad,
        bytes_accessed=(M_pad * K * x_item + K * N_pad * w_item
                        + (N_pad * 4 if has_bias else 0)
                        + M_pad * N_pad * o_item))

    kernel = functools.partial(_fixnorm_kernel, g_scale=g_scale, eps=eps,
                               has_bias=has_bias, multi_n=multi_n)

    def _run(resident_single_buffer):
        x_spec = pl.BlockSpec((tile_m, K), lambda i, j: (i, 0))
        if multi_n:
            wt_spec = pl.BlockSpec((K, tile_n), lambda i, j: (0, j))
            b_spec = pl.BlockSpec((1, tile_n), lambda i, j: (0, j))
        elif resident_single_buffer:
            # Constant-index resident blocks: a second buffer is pure VMEM waste.
            wt_spec = pl.BlockSpec((K, tile_n), lambda i, j: (0, 0),
                                   pipeline_mode=pl.Buffered(1))
            b_spec = pl.BlockSpec((1, tile_n), lambda i, j: (0, 0),
                                  pipeline_mode=pl.Buffered(1))
        else:
            wt_spec = pl.BlockSpec((K, tile_n), lambda i, j: (0, 0))
            b_spec = pl.BlockSpec((1, tile_n), lambda i, j: (0, 0))
        in_specs = [x_spec, wt_spec] + ([b_spec] if has_bias else [])
        return pl.pallas_call(
            kernel,
            out_shape=jax.ShapeDtypeStruct((M_pad, N_pad), x.dtype),
            grid_spec=pltpu.PrefetchScalarGridSpec(
                num_scalar_prefetch=0,
                grid=(M_pad // tile_m, N_pad // tile_n),
                in_specs=in_specs,
                out_specs=pl.BlockSpec((tile_m, tile_n), lambda i, j: (i, j)),
                scratch_shapes=scratch_shapes),
            compiler_params=pltpu.CompilerParams(
                # N axis carries the cached xn scratch -> keep it sequential.
                dimension_semantics=("parallel", "arbitrary"),
                vmem_limit_bytes=vmem_limit),
            cost_estimate=cost,
        )(*operands)

    if multi_n:
        out2 = _run(False)
    else:
        try:
            out2 = _run(True)
        except Exception:
            # Fallback if this Pallas build rejects single-buffered resident blocks.
            out2 = _run(False)

    if M_pad != M or N_pad != N:
        out2 = out2[:M, :N]
    return out2.reshape(*lead_shape, N)


def _reference(x, weights, bias, eps=1e-5):
    g_scale = math.sqrt(weights.shape[0])
    w_inv = 1.0 / jnp.maximum(
        jnp.linalg.norm(weights, axis=-1, keepdims=True), eps)
    x_inv = 1.0 / jnp.maximum(
        jnp.linalg.norm(x, axis=-1, keepdims=True), eps)
    out = g_scale * jnp.matmul(x * x_inv, (weights * w_inv).T)
    if bias is not None:
        out = out + bias
    return out


if __name__ == "__main__":
    key = jax.random.PRNGKey(0)
    kx, kw, kx3, kw3 = jax.random.split(key, 4)

    # --- test 1: module-consistent small shapes (batch=2, seq=8, hidden=32) --
    in_size = out_size = 32
    batch, seq = 2, 8
    x = jax.random.normal(kx, (batch, seq, in_size), dtype=jnp.float32)
    # Deterministic param init mirroring the module's __init__:
    #   weights ~ xavier_uniform over (in_size, out_size); bias = 0.01.
    bound = math.sqrt(6.0 / (in_size + out_size))
    weights = jax.random.uniform(kw, (in_size, out_size), dtype=jnp.float32,
                                 minval=-bound, maxval=bound)
    bias = jnp.full((out_size,), 0.01, dtype=jnp.float32)

    out = jax.block_until_ready(fixnorm_linear(x, weights, bias))
    ref = _reference(x, weights, bias)
    assert out.shape == (batch, seq, out_size)
    assert jnp.allclose(out, ref, atol=2e-5, rtol=2e-5), float(
        jnp.max(jnp.abs(out - ref)))

    # --- test 2: bias=None path (no zeros buffer, no bias add in kernel) ----
    out_nb = jax.block_until_ready(fixnorm_linear(x, weights, None))
    ref_nb = _reference(x, weights, None)
    assert jnp.allclose(out_nb, ref_nb, atol=2e-5, rtol=2e-5), float(
        jnp.max(jnp.abs(out_nb - ref_nb)))

    # --- test 3: exercise the N-tiled (non-resident W) path at a small size --
    d3 = 256
    x3 = jax.random.normal(kx3, (batch, seq, d3), dtype=jnp.float32)
    bound3 = math.sqrt(6.0 / (2 * d3))
    w3 = jax.random.uniform(kw3, (d3, d3), dtype=jnp.float32,
                            minval=-bound3, maxval=bound3)
    b3 = jnp.full((d3,), 0.01, dtype=jnp.float32)
    out3 = jax.block_until_ready(fixnorm_linear(x3, w3, b3, force_tile_n=128))
    ref3 = _reference(x3, w3, b3)
    assert jnp.allclose(out3, ref3, atol=2e-4, rtol=2e-4), float(
        jnp.max(jnp.abs(out3 - ref3)))

    print("KERNEL_OK")
</pallas_src>

<mosaic_0001>
module attributes {stable_mosaic.version = 11 : i64} {
  func.func @_wnorm_t_kernel(%arg0: i32, %arg1: memref<128x32xf32, #tpu.memory_space<vmem>>, %arg2: memref<32x128xf32, #tpu.memory_space<vmem>>) attributes {dimension_semantics = [#tpu.dimension_semantics<parallel>], iteration_bounds = array<i64: 1>, scalar_prefetch = 0 : i64, scratch_operands = 0 : i64, tpu.core_type = #tpu.core_type<tc>, window_params = [{transform_indices = @transform_0, window_bounds = array<i64: 128, 32>}, {transform_indices = @transform_1, window_bounds = array<i64: 32, 128>}]} {
    %c0 = arith.constant 0 : index
    %c0_0 = arith.constant 0 : index
    %0 = vector.load %arg1[%c0, %c0_0] : memref<128x32xf32, #tpu.memory_space<vmem>>, vector<128x32xf32>
    %1 = arith.mulf %0, %0 : vector<128x32xf32>
    %cst = arith.constant dense<0.000000e+00> : vector<128xf32>
    %2 = vector.multi_reduction <add>, %1, %cst [1] : vector<128x32xf32> to vector<128xf32>
    %3 = vector.shape_cast %2 : vector<128xf32> to vector<128x1xf32>
    %cst_1 = arith.constant 1.000000e-10 : f32
    %4 = vector.broadcast %cst_1 : f32 to vector<128x1xf32>
    %5 = arith.maximumf %3, %4 : vector<128x1xf32>
    %6 = math.rsqrt %5 : vector<128x1xf32>
    %7 = vector.broadcast %6 : vector<128x1xf32> to vector<128x32xf32>
    %8 = arith.mulf %0, %7 : vector<128x32xf32>
    %9 = tpu.transpose %8, [1, 0] : vector<128x32xf32> -> vector<32x128xf32>
    %c0_2 = arith.constant 0 : index
    %c0_3 = arith.constant 0 : index
    %10 = vector.load %arg2[%c0_2, %c0_3] : memref<32x128xf32, #tpu.memory_space<vmem>>, vector<32x128xf32>
    tpu.vector_store %arg2[%c0_2, %c0_3], %9 {strides = array<i32>} : memref<32x128xf32, #tpu.memory_space<vmem>>, vector<32x128xf32>,
    return
  }
  func.func @transform_0(%arg0: i32) -> (i32, i32) {
    %c0_i32 = arith.constant 0 : i32
    %c0_i32_0 = arith.constant 0 : i32
    return %arg0, %c0_i32 : i32, i32
  }
  func.func @transform_1(%arg0: i32) -> (i32, i32) {
    %c0_i32 = arith.constant 0 : i32
    %c0_i32_0 = arith.constant 0 : i32
    return %c0_i32, %arg0 : i32, i32
  }
}

</mosaic_0001>

<bundles_post_ra>
// kernel: tpu_custom_call.1
= control target key start
LH: loop header
LB: loop body
LE: loop exit
PB: predicated region body
PF: predicated region fallthrough
CT: control target
= control target key end

     0   :  { %vm41_vm0 = vcmask 261120   ;;  %s418_s0 = inlined_call_operand.vmem [shape: f32[128,32], index: 0, kind: input, shape index: {}]   ;;  %s419_s1 = inlined_call_operand.hbm [shape: f32[32,128], index: 1, kind: output, shape index: {}]  }
   0x1   :  { %v265_v0 = vld [vmem:[%s418_s0] sm:$0xff]  ;;  %v270_v1 = vld [vmem:[%s418_s0 + $0x8] sm:$0xff]  ;;  %v275_v2 = vld [vmem:[%s418_s0 + $0x10] sm:$0xff] }
   0x2   :  { %v25_v3 = vmul.f32 %v265_v0, %v265_v0  ;;  %v26_v4 = vmul.f32 %v270_v1, %v270_v1  ;;  %v27_v5 = vmul.f32 %v275_v2, %v275_v2  ;;  %v286_v6 = vld [vmem:[%s418_s0 + $0x18] sm:$0xff]  ;;  %v293_v8 = vld [vmem:[%s418_s0 + $0x20] sm:$0xff]  ;;  %v298_v9 = vld [vmem:[%s418_s0 + $0x28] sm:$0xff] }
   0x3   :  { %v28_v7 = vmul.f32 %v286_v6, %v286_v6  ;;  %v29_v14 = vmul.f32 %v293_v8, %v293_v8  ;;  %v30_v15 = vmul.f32 %v298_v9, %v298_v9 }
   0x4   :  { %v42_v10 = vsel %vm41_vm0, %v25_v3, 0.0  ;;  %v48_v11 = vsel %vm41_vm0, %v27_v5, 0.0  ;;  %v45_v12 = vsel %vm41_vm0, %v26_v4, 0.0 }
   0x5   :  { %43 = vadd.xlane.f32.xlu0 %v42_v10  ;;  %49 = vadd.xlane.f32.xlu1 %v48_v11  ;;  %v51_v13 = vsel %vm41_vm0, %v28_v7, 0.0 }
   0x6   :  { %6 = vsyncpa [#allocation3], 0  ;;  %v311_v16 = vld [vmem:[%s418_s0 + $0x30] sm:$0xff]  ;;  %v316_v17 = vld [vmem:[%s418_s0 + $0x38] sm:$0xff]  ;;  %v54_v18 = vsel %vm41_vm0, %v29_v14, 0.0  ;;  %v57_v19 = vsel %vm41_vm0, %v30_v15, 0.0 }
   0x7   :  { %v31_v20 = vmul.f32 %v311_v16, %v311_v16  ;;  %v32_v21 = vmul.f32 %v316_v17, %v316_v17  ;;  %v327_v22 = vld [vmem:[%s418_s0 + $0x40] sm:$0xff]  ;;  %v332_v23 = vld [vmem:[%s418_s0 + $0x48] sm:$0xff]  ;;  %v343_v28 = vld [vmem:[%s418_s0 + $0x50] sm:$0xff] }
   0x8   :  { %v33_v26 = vmul.f32 %v327_v22, %v327_v22  ;;  %v34_v27 = vmul.f32 %v332_v23, %v332_v23  ;;  %v348_v29 = vld [vmem:[%s418_s0 + $0x58] sm:$0xff]  ;;  %v35_v32 = vmul.f32 %v343_v28, %v343_v28  ;;  %v359_v34 = vld [vmem:[%s418_s0 + $0x60] sm:$0xff]  ;;  %v364_v35 = vld [vmem:[%s418_s0 + $0x68] sm:$0xff] }
   0x9   :  { %46 = vadd.xlane.f32.xlu0 %v45_v12  ;;  %52 = vadd.xlane.f32.xlu1 %v51_v13  ;;  %v60_v24 = vsel %vm41_vm0, %v31_v20, 0.0  ;;  %v63_v25 = vsel %vm41_vm0, %v32_v21, 0.0  ;;  %v36_v33 = vmul.f32 %v348_v29, %v348_v29  ;;  %v37_v38 = vmul.f32 %v359_v34, %v359_v34  ;;  %v375_v40 = vld [vmem:[%s418_s0 + $0x70] sm:$0xff]  ;;  %v380_v41 = vld [vmem:[%s418_s0 + $0x78] sm:$0xff]  ;;  %s249_s0 = smov [#allocation2]  }
   0xa   :  { %v66_v30 = vsel %vm41_vm0, %v33_v26, 0.0  ;;  %v69_v31 = vsel %vm41_vm0, %v34_v27, 0.0  ;;  %v72_v36 = vsel %vm41_vm0, %v35_v32, 0.0  ;;  %v38_v39 = vmul.f32 %v364_v35, %v364_v35  ;;  %s179_s9 = sshll.u32 %s249_s0, 4  ;;  %s180_s9 = int_to_ptr.vmem [resolvable:$true] %s179_s9 }
   0xb   :  { %v75_v37 = vsel %vm41_vm0, %v36_v33, 0.0  ;;  %v78_v42 = vsel %vm41_vm0, %v37_v38, 0.0  ;;  %v39_v44 = vmul.f32 %v375_v40, %v375_v40  ;;  %v40_v45 = vmul.f32 %v380_v41, %v380_v41  ;;  %s225_s10 = scalar_lea.vmem %s180_s9, 512  ;;  %p230_p1 = scmp.lt.s32.totalorder %s180_s9, %s180_s9 }
   0xc   :  { %v81_v43 = vsel %vm41_vm0, %v38_v39, 0.0  ;;  %p226_p0 = scmp.ne.s32.totalorder %s180_s9, %s225_s10  ;;  %p231_p2 = scmp.lt.s32.totalorder %s225_s10, %s225_s10 }
   0xd   :  { %55 = vadd.xlane.f32.xlu0 %v54_v18  ;;  %58 = vadd.xlane.f32.xlu1 %v57_v19  ;;  %v84_v46 = vsel %vm41_vm0, %v39_v44, 0.0  ;;  %v87_v47 = vsel %vm41_vm0, %v40_v45, 0.0 }
   0xe   :  { %p232_p3 = por %p231_p2, %p230_p1 }
  0x10   :  { %p233_p4 = pnand %p232_p3, %p226_p0 }
  0x11   :  { %61 = vadd.xlane.f32.xlu0 %v60_v24  ;;  %64 = vadd.xlane.f32.xlu1 %v63_v25 }
  0x15   :  { %67 = vadd.xlane.f32.xlu0 %v66_v30  ;;  %70 = vadd.xlane.f32.xlu1 %v69_v31 }
  0x19   :  { %73 = vadd.xlane.f32.xlu0 %v72_v36  ;;  %76 = vadd.xlane.f32.xlu1 %v75_v37 }
  0x1d   :  { %79 = vadd.xlane.f32.xlu0 %v78_v42  ;;  %82 = vadd.xlane.f32.xlu1 %v81_v43 }
  0x21   :  { %85 = vadd.xlane.f32.xlu0 %v84_v46  ;;  %88 = vadd.xlane.f32.xlu1 %v87_v47 }
  0x92   :  { %v44_v48 = vpop.xlane.xlu0 %43  ;;  %v50_v49 = vpop.xlane.xlu1 %49 }
  0x93   :  { %v90_v50 = vmax.f32 %v44_v48, 1e-10  ;;  %v92_v51 = vmax.f32 %v50_v49, 1e-10 }
  0x95   :  { %193 = vrsqrt.f32 %v90_v50 }
  0x96   :  { %v47_v52 = vpop.xlane.xlu0 %46  ;;  %v53_v53 = vpop.xlane.xlu1 %52  ;;  %195 = vrsqrt.f32 %v92_v51 }
  0x97   :  { %v91_v54 = vmax.f32 %v47_v52, 1e-10  ;;  %v93_v55 = vmax.f32 %v53_v53, 1e-10 }
  0x99   :  { %197 = vrsqrt.f32 %v91_v54 }
  0x9a   :  { %v56_v56 = vpop.xlane.xlu0 %55  ;;  %199 = vrsqrt.f32 %v93_v55  ;;  %v59_v58 = vpop.xlane.xlu1 %58 }
  0x9b   :  { %v94_v57 = vmax.f32 %v56_v56, 1e-10  ;;  %v95_v61 = vmax.f32 %v59_v58, 1e-10 }
  0x9d   :  { %201 = vrsqrt.f32 %v94_v57 }
  0x9e   :  { %v62_v63 = vpop.xlane.xlu0 %61  ;;  %203 = vrsqrt.f32 %v95_v61  ;;  %v65_v10 = vpop.xlane.xlu1 %64 }
  0x9f   :  { %v194_v59 = vpop.eup %193  ;;  %v96_v5 = vmax.f32 %v62_v63, 1e-10  ;;  %v97_v12 = vmax.f32 %v65_v10, 1e-10 }
  0xa0   :  { %v122_v60 = vmul.f32 %v194_v59, %v265_v0  ;;  %v196_v62 = vpop.eup %195 }
  0xa1   :  { %v124_v7 = vmul.f32 %v196_v62, %v275_v2  ;;  %205 = vrsqrt.f32 %v96_v5 }
  0xa2   :  { %138 = vxpose.xlu0.b32.start [1/16] (narrow) %v122_v60, 32  ;;  %v68_v13 = vpop.xlane.xlu0 %67  ;;  %207 = vrsqrt.f32 %v97_v12 }
  0xa3   :  { %v198_v3 = vpop.eup %197  ;;  %v98_v15 = vmax.f32 %v68_v13, 1e-10 }
  0xa4   :  { %v123_v4 = vmul.f32 %v198_v3, %v270_v1  ;;  %v200_v11 = vpop.eup %199  ;;  %v71_v1 = vpop.xlane.xlu1 %70 }
  0xa5   :  { %v125_v0 = vmul.f32 %v200_v11, %v286_v6  ;;  %209 = vrsqrt.f32 %v98_v15  ;;  %v99_v20 = vmax.f32 %v71_v1, 1e-10 }
  0xa6   :  { %139 = vxpose.xlu0.b32.cont [2/16] (narrow) %v123_v4, 32  ;;  %v74_v21 = vpop.xlane.xlu0 %73 }
  0xa7   :  { %v202_v14 = vpop.eup %201  ;;  %211 = vrsqrt.f32 %v99_v20  ;;  %v100_v25 = vmax.f32 %v74_v21, 1e-10 }
  0xa8   :  { %v126_v18 = vmul.f32 %v202_v14, %v293_v8  ;;  %v204_v19 = vpop.eup %203  ;;  %v77_v26 = vpop.xlane.xlu1 %76 }
  0xa9   :  { %v127_v2 = vmul.f32 %v204_v19, %v298_v9  ;;  %213 = vrsqrt.f32 %v100_v25  ;;  %v101_v30 = vmax.f32 %v77_v26, 1e-10 }
  0xaa   :  { %140 = vxpose.xlu0.b32.cont [3/16] (narrow) %v124_v7, 32  ;;  %v80_v31 = vpop.xlane.xlu0 %79 }
  0xab   :  { %v206_v24 = vpop.eup %205  ;;  %215 = vrsqrt.f32 %v101_v30  ;;  %v102_v33 = vmax.f32 %v80_v31, 1e-10 }
  0xac   :  { %v128_v6 = vmul.f32 %v206_v24, %v311_v16  ;;  %v208_v27 = vpop.eup %207  ;;  %v83_v36 = vpop.xlane.xlu1 %82 }
  0xad   :  { %v129_v8 = vmul.f32 %v208_v27, %v316_v17  ;;  %217 = vrsqrt.f32 %v102_v33  ;;  %v103_v38 = vmax.f32 %v83_v36, 1e-10 }
  0xae   :  { %141 = vxpose.xlu0.b32.cont [4/16] (narrow) %v125_v0, 32  ;;  %v86_v39 = vpop.xlane.xlu0 %85 }
  0xaf   :  { %v210_v32 = vpop.eup %209  ;;  %219 = vrsqrt.f32 %v103_v38  ;;  %v104_v43 = vmax.f32 %v86_v39, 1e-10 }
  0xb0   :  { %v130_v9 = vmul.f32 %v210_v32, %v327_v22  ;;  %v89_v44 = vpop.xlane.xlu1 %88 }
  0xb1   :  { %v212_v37 = vpop.eup %211  ;;  %221 = vrsqrt.f32 %v104_v43  ;;  %v105_v46 = vmax.f32 %v89_v44, 1e-10 }
  0xb2   :  { %142 = vxpose.xlu0.b32.cont [5/16] (narrow) %v126_v18, 32  ;;  %v131_v16 = vmul.f32 %v212_v37, %v332_v23 }
  0xb3   :  { %v214_v42 = vpop.eup %213  ;;  %223 = vrsqrt.f32 %v105_v46 }
  0xb4   :  { %v132_v17 = vmul.f32 %v214_v42, %v343_v28 }
  0xb5   :  { %v216_v45 = vpop.eup %215 }
  0xb6   :  { %143 = vxpose.xlu0.b32.cont [6/16] (narrow) %v127_v2, 32  ;;  %v133_v22 = vmul.f32 %v216_v45, %v348_v29 }
  0xb7   :  { %v218_v47 = vpop.eup %217 }
  0xb8   :  { %v134_v48 = vmul.f32 %v218_v47, %v359_v34 }
  0xb9   :  { %v220_v23 = vpop.eup %219 }
  0xba   :  { %144 = vxpose.xlu0.b32.cont [7/16] (narrow) %v128_v6, 32  ;;  %v135_v49 = vmul.f32 %v220_v23, %v364_v35 }
  0xbb   :  { %v222_v50 = vpop.eup %221 }
  0xbc   :  { %v136_v28 = vmul.f32 %v222_v50, %v375_v40 }
  0xbd   :  { %v224_v51 = vpop.eup %223 }
  0xbe   :  { %145 = vxpose.xlu0.b32.cont [8/16] (narrow) %v129_v8, 32  ;;  %v137_v52 = vmul.f32 %v224_v51, %v380_v41 }
  0xc2   :  { %146 = vxpose.xlu0.b32.cont [9/16] (narrow) %v130_v9, 32 }
  0xc6   :  { %147 = vxpose.xlu0.b32.cont [10/16] (narrow) %v131_v16, 32 }
  0xca   :  { %148 = vxpose.xlu0.b32.cont [11/16] (narrow) %v132_v17, 32 }
  0xce   :  { %149 = vxpose.xlu0.b32.cont [12/16] (narrow) %v133_v22, 32 }
  0xd2   :  { %150 = vxpose.xlu0.b32.cont [13/16] (narrow) %v134_v48, 32 }
  0xd6   :  { %151 = vxpose.xlu0.b32.cont [14/16] (narrow) %v135_v49, 32 }
  0xda   :  { %152 = vxpose.xlu0.b32.cont [15/16] (narrow) %v136_v28, 32 }
  0xde   :  { %153 = vxpose.xlu0.b32.end [16/16] (narrow) %v137_v52, 32 }
 0x122   :  { %v154_v53 = vpop.trf.xlu0 }
 0x123   :  { %170 = vst [vmem:[#allocation2] sm:$0xff] %v154_v53 }
 0x126   :  { %v155_v29 = vpop.trf.xlu0 }
 0x127   :  { %171 = vst [vmem:[#allocation2 + $0x8] sm:$0xff] %v155_v29 }
 0x12a   :  { %v156_v34 = vpop.trf.xlu0 }
 0x12b   :  { %172 = vst [vmem:[#allocation2 + $0x10] sm:$0xff] %v156_v34 }
 0x12e   :  { %v157_v54 = vpop.trf.xlu0 }
 0x12f   :  { %173 = vst [vmem:[#allocation2 + $0x18] sm:$0xff] %v157_v54 }
 0x130   :  { %236 = shalt.err (!%p233_p4)
}
 0x131   :  { %s237_s13 = scalar_lea.hbm %s419_s1, 512 }
 0x132   :  { %p238_p5 = scmp.ne.s32.totalorder %s419_s1, %s237_s13  ;;  %p241_p6 = scmp.lt.u32.totalorder %s237_s13, %s419_s1 }
 0x134   :  { %p243_p7 = pnand %p241_p6, %p238_p5 }
 0x136   :  { %246 = shalt.err (!%p243_p7)
}
 0x137   :  { %s250_s18 = smov 128   ;;  %s251_s19 = smov 8  }
 0x138   :  { %185 = dma.vmem_to_hbm [thread:$0]  %s180_s9, 512, %s419_s1, [#allocation3], %s250_s18, %s250_s18, %s251_s19  }
 0x139   :  { %247 = dma.done.wait [#allocation3], 512  }
 0x13a   :  { %248 = vsyncadd [#allocation3], 4294966784 }
 0x13b   :  { %189 = vsyncpa [#allocation3], 1 }

</bundles_post_ra>
